<compile_context>
chip_gen: v7x
topology: tpu7x:2x2x1
jax: 0.10.0
libtpu: 0.0.40
codegen_flags: <defaults>
</compile_context>

<pallas_src>
import jax
import jax.numpy as jnp
import numpy as np
from jax import lax
from jax.experimental import pallas as pl
from jax.experimental.pallas import tpu as pltpu

# ----------------------------- problem sizes ------------------------------
BERT_DIM = 32     # args.bert_feature_dim
MAX_SEQ = 8       # args.max_sequence_len  (== input sequence length)
CLASS_NUM = 6     # args.class_num
INT_HIDDEN = 64   # hidden width of intensity_head
VOCAB = 64

LN_EPS = 1e-5     # torch.nn.LayerNorm default eps
COS_EPS = 1e-8    # torch cosine_similarity default eps
SQRT_2_OVER_PI = 0.7978845608028654


# ----------------------- packed-weight buffer layout -----------------------
def _pack_layout(B, S, D, C, H):
    """Row offsets of every parameter block inside the single packed
    [rows, B*S*S] weight buffer (one input DMA instead of 13)."""
    BS = B * S
    sizes = [
        ('E', BS), ('F', BS),            # 0/1 pair-expansion matrices
        ('w1aT', S), ('w1bT', S),        # linear1 split weights, transposed
        ('g0b', D), ('bt0b', D),         # norm0 gamma/beta, pre-broadcast
        ('wi2T', 2),                     # intensity fc2 weight, transposed
        ('whT', C + 2 + H),              # fused [cls | cls1 | intensity fc1]
        ('b1', S), ('g1', S), ('bt1', S),  # linear1 bias / norm1, pre-broadcast
        ('bh', C + 2 + H),               # fused head bias, pre-broadcast
        ('bi2', 2),                      # intensity fc2 bias, pre-broadcast
    ]
    off, r = {}, 0
    for name, n in sizes:
        off[name] = r
        r += n
    total = ((r + 7) // 8) * 8
    return off, total


def _build_weight_pack(p, off, total, B, S, D, C, H):
    BS, NP = B * S, B * S * S
    # 0/1 expansion matrices mapping token index -> flat pair column
    #   column c = b*S*S + i*S + j ; E picks token (b,i), F picks token (b,j).
    cols = np.arange(NP)
    rows = np.arange(BS)
    E = (cols[None, :] // S == rows[:, None]).astype(np.float32)
    F = ((cols[None, :] // (S * S)) * S + (cols[None, :] % S)
         == rows[:, None]).astype(np.float32)

    whT = jnp.concatenate([p['wc'], p['wc1'], p['wi1']], axis=1).T   # [C+2+H, S]
    bh = jnp.concatenate([p['bc'], p['bc1'], p['bi1']], axis=1)      # [1, C+2+H]

    blocks = {
        'E': jnp.asarray(E),
        'F': jnp.asarray(F),
        'w1aT': p['w1a'].T,                                          # [S, D]
        'w1bT': p['w1b'].T,                                          # [S, D]
        'g0b': jnp.broadcast_to(p['g0'].T, (D, BS)),
        'bt0b': jnp.broadcast_to(p['bt0'].T, (D, BS)),
        'wi2T': p['wi2'].T,                                          # [2, H]
        'whT': whT,
        'b1': jnp.broadcast_to(p['b1'].T, (S, NP)),
        'g1': jnp.broadcast_to(p['g1'].T, (S, NP)),
        'bt1': jnp.broadcast_to(p['bt1'].T, (S, NP)),
        'bh': jnp.broadcast_to(bh.T, (C + 2 + H, NP)),
        'bi2': jnp.broadcast_to(p['bi2'].T, (2, NP)),
    }
    buf = jnp.zeros((total, NP), jnp.float32)
    for name, x in blocks.items():
        r0 = off[name]
        buf = buf.at[r0:r0 + x.shape[0], 0:x.shape[1]].set(x.astype(jnp.float32))
    return buf


# -------------------------------- kernel ----------------------------------
def _make_kernel(B, S, D, C, H, off):
    BS, NP = B * S, B * S * S
    CH = C + 2 + H

    def kernel(featT_ref, maskf_ref, w_ref, out_ref):
        m = maskf_ref[...]                                            # [1, NP]

        # ---------------- norm0 (LayerNorm over the feature dim) -----------
        # feature-major layout: [D, B*S]; reduce over the sublane (D) axis.
        ft = featT_ref[...]                                           # [D, BS]
        mu = jnp.mean(ft, axis=0, keepdims=True)
        var = jnp.mean(jnp.square(ft - mu), axis=0, keepdims=True)
        g0 = w_ref[off['g0b']:off['g0b'] + D, 0:BS]
        bt0 = w_ref[off['bt0b']:off['bt0b'] + D, 0:BS]
        fnT = (ft - mu) * lax.rsqrt(var + LN_EPS) * g0 + bt0          # [D, BS]

        # ------- expand token features into the flat (b,i,j) pair space ----
        # fi[:, c] = fnT[:, (b,i)], fj[:, c] = fnT[:, (b,j)] via 0/1 matmuls
        # (MXU layout work; keeps everything downstream fully lane-dense).
        expi = w_ref[off['E']:off['E'] + BS, :]                       # [BS, NP]
        expj = w_ref[off['F']:off['F'] + BS, :]                       # [BS, NP]
        fi = jnp.dot(fnT, expi, preferred_element_type=jnp.float32)   # [D, NP]
        fj = jnp.dot(fnT, expj, preferred_element_type=jnp.float32)   # [D, NP]

        # ---------------- pairwise cosine similarity (lane-dense) ----------
        dots = jnp.sum(fi * fj, axis=0, keepdims=True)                # [1, NP]
        sq_i = jnp.sum(fi * fi, axis=0, keepdims=True)                # [1, NP]
        sq_j = jnp.sum(fj * fj, axis=0, keepdims=True)                # [1, NP]
        inv = lax.rsqrt(jnp.maximum(sq_i * sq_j, COS_EPS * COS_EPS))
        sim = dots * inv * m                                          # [1, NP]

        # ------------ linear1 on concat(f_i, f_j), already transposed ------
        w1aT = w_ref[off['w1aT']:off['w1aT'] + S, 0:D]                # [S, D]
        w1bT = w_ref[off['w1bT']:off['w1bT'] + S, 0:D]                # [S, D]
        b1 = w_ref[off['b1']:off['b1'] + S, :]                        # [S, NP]
        h = (jnp.dot(w1aT, fi, preferred_element_type=jnp.float32)
             + jnp.dot(w1bT, fj, preferred_element_type=jnp.float32)
             + b1)                                                    # [S, NP]

        # ------- norm1 over sublanes + tanh-approx GELU (EUP tanh) ---------
        hmu = jnp.mean(h, axis=0, keepdims=True)
        hvar = jnp.mean(jnp.square(h - hmu), axis=0, keepdims=True)
        g1 = w_ref[off['g1']:off['g1'] + S, :]
        bt1 = w_ref[off['bt1']:off['bt1'] + S, :]
        hn = (h - hmu) * lax.rsqrt(hvar + LN_EPS) * g1 + bt1          # [S, NP]
        act = 0.5 * hn * (1.0 + jnp.tanh(
            SQRT_2_OVER_PI * (hn + 0.044715 * hn * hn * hn)))         # [S, NP]

        # -------- fused heads: [cls_linear | cls_linear1 | intensity fc1] --
        whT = w_ref[off['whT']:off['whT'] + CH, 0:S]                  # [CH, S]
        bh = w_ref[off['bh']:off['bh'] + CH, :]                       # [CH, NP]
        heads = jnp.dot(whT, act, preferred_element_type=jnp.float32) + bh

        cls = heads[0:C + 2, :] * m                                   # [C+2, NP]

        iact = heads[C + 2:CH, :]                                     # [H, NP]
        iact = jnp.where(iact >= 0.0, iact, 0.01 * iact)              # LeakyReLU
        wi2T = w_ref[off['wi2T']:off['wi2T'] + 2, 0:H]                # [2, H]
        bi2 = w_ref[off['bi2']:off['bi2'] + 2, :]                     # [2, NP]
        inten = jax.nn.sigmoid(
            jnp.dot(wi2T, iact, preferred_element_type=jnp.float32) + bi2)  # [2, NP]

        # ---------------- single lane-dense fused output slab --------------
        out_ref[0:C + 2, :] = cls
        out_ref[C + 2:C + 3, :] = sim
        out_ref[C + 3:C + 5, :] = inten

    return kernel


# ------------------------------- wrapper -----------------------------------
@jax.jit
def model_head_forward(bert_feature, masks, params):
    B, S, D = bert_feature.shape
    C = params['wc'].shape[1]
    H = params['wi1'].shape[1]
    BS, NP = B * S, B * S * S

    off, total = _pack_layout(B, S, D, C, H)
    wpack = _build_weight_pack(params, off, total, B, S, D, C, H)
    featT = bert_feature.reshape(BS, D).T          # [D, B*S]  (layout plumbing)
    maskf = masks.reshape(1, NP)                   # [1, B*S*S]

    kernel = _make_kernel(B, S, D, C, H, off)
    out = pl.pallas_call(
        kernel,
        out_shape=jax.ShapeDtypeStruct((C + 5, NP), jnp.float32),
        grid_spec=pltpu.PrefetchScalarGridSpec(
            num_scalar_prefetch=0,
            grid=(1,),
            in_specs=[pl.BlockSpec((D, BS), lambda i: (0, 0)),
                      pl.BlockSpec((1, NP), lambda i: (0, 0)),
                      pl.BlockSpec((total, NP), lambda i: (0, 0))],
            out_specs=pl.BlockSpec((C + 5, NP), lambda i: (0, 0))),
        compiler_params=pltpu.CompilerParams(
            dimension_semantics=("arbitrary",)),
    )(featT, maskf, wpack)

    cls = out[0:C + 2, :].T.reshape(B, S, S, C + 2)
    sim = out[C + 2, :].reshape(B, S, S)
    inten = out[C + 3:C + 5, :].T.reshape(B, S, S, 2)
    return cls[..., :C], cls[..., C:], sim, inten


# --------------------------- pure-JAX reference -----------------------------
def _layer_norm(x, gamma, beta):
    mu = jnp.mean(x, axis=-1, keepdims=True)
    var = jnp.mean(jnp.square(x - mu), axis=-1, keepdims=True)
    return (x - mu) * lax.rsqrt(var + LN_EPS) * gamma + beta


def reference_forward(bert_feature, masks, p):
    from jax.scipy.special import erf
    B, S, D = bert_feature.shape
    with jax.default_matmul_precision('highest'):
        fn = _layer_norm(bert_feature, p['g0'][0], p['bt0'][0])
        bf = jnp.broadcast_to(fn[:, :, None, :], (B, S, S, D))
        bfT = jnp.swapaxes(bf, 1, 2)
        features = jnp.concatenate([bf, bfT], axis=3)
        dots = jnp.sum(bf * bfT, axis=3)
        denom = jnp.linalg.norm(bf, axis=3) * jnp.linalg.norm(bfT, axis=3)
        sim = dots / jnp.maximum(denom, COS_EPS) * masks
        W1 = jnp.concatenate([p['w1a'], p['w1b']], axis=0)      # [2D, S]
        hidden = features @ W1 + p['b1'][0]
        hidden = _layer_norm(hidden, p['g1'][0], p['bt1'][0])
        hidden = 0.5 * hidden * (1.0 + erf(hidden * 0.7071067811865476))
        logits = hidden @ p['wc'] + p['bc'][0]
        logits1 = hidden @ p['wc1'] + p['bc1'][0]
        ih = hidden @ p['wi1'] + p['bi1'][0]
        ih = jnp.where(ih >= 0, ih, 0.01 * ih)
        inten = jax.nn.sigmoid(ih @ p['wi2'] + p['bi2'][0])
    m = masks[..., None]
    return logits * m, logits1 * m, sim, inten


# ------------------------------ parameters ---------------------------------
def init_params(key):
    D, S, C, H = BERT_DIM, MAX_SEQ, CLASS_NUM, INT_HIDDEN
    ks = jax.random.split(key, 12)

    def lin(k, fan_in, shape):
        return jax.random.normal(k, shape, jnp.float32) / np.sqrt(fan_in)

    return dict(
        tok_emb=jax.random.normal(ks[0], (VOCAB, D), jnp.float32) * 0.5,
        pos_emb=jax.random.normal(ks[1], (S, D), jnp.float32) * 0.1,
        g0=jnp.ones((1, D), jnp.float32)
           + 0.05 * jax.random.normal(ks[2], (1, D), jnp.float32),
        bt0=0.05 * jax.random.normal(ks[3], (1, D), jnp.float32),
        w1a=lin(ks[4], 2 * D, (D, S)),
        w1b=lin(ks[5], 2 * D, (D, S)),
        b1=0.02 * jax.random.normal(ks[6], (1, S), jnp.float32),
        g1=jnp.ones((1, S), jnp.float32),
        bt1=jnp.zeros((1, S), jnp.float32),
        wc=lin(ks[7], S, (S, C)),
        bc=jnp.zeros((1, C), jnp.float32),
        wc1=lin(ks[8], S, (S, 2)),
        bc1=jnp.zeros((1, 2), jnp.float32),
        wi1=lin(ks[9], S, (S, H)),
        bi1=0.02 * jax.random.normal(ks[10], (1, H), jnp.float32),
        wi2=lin(ks[11], H, (H, 2)),
        bi2=jnp.zeros((1, 2), jnp.float32),
    )


# --------------------------------- main -------------------------------------
if __name__ == "__main__":
    key = jax.random.PRNGKey(0)
    kp, kt = jax.random.split(key)
    params = init_params(kp)

    B, S = 2, MAX_SEQ
    tokens = jax.random.randint(kt, (B, S), 0, VOCAB)
    lengths = jnp.array([S, 5])
    valid = (jnp.arange(S)[None, :] < lengths[:, None]).astype(jnp.float32)  # [B, S]
    masks = valid[:, :, None] * valid[:, None, :]                            # [B, S, S]

    # TODO(synk): synthetic stand-in for the pretrained RobertaModel backbone.
    bert_feature = params['tok_emb'][tokens] + params['pos_emb'][None, :, :]  # [B, S, D]

    outs = jax.block_until_ready(model_head_forward(bert_feature, masks, params))
    refs = reference_forward(bert_feature, masks, params)

    # 3e-3 tolerance: the kernel uses tanh-approx GELU (max ~4e-4/element
    # before the small head matmuls) while the reference uses exact erf GELU.
    for name, o, r in zip(("logits", "logits1", "sim_matrix", "intensity_logits"),
                          outs, refs):
        np.testing.assert_allclose(np.asarray(o), np.asarray(r),
                                   atol=3e-3, rtol=3e-3, err_msg=name)

    print("KERNEL_OK")
</pallas_src>

<mosaic_0001>
module attributes {stable_mosaic.version = 11 : i64} {
  func.func @kernel(%arg0: i32, %arg1: memref<32x16xf32, #tpu.memory_space<vmem>>, %arg2: memref<1x128xf32, #tpu.memory_space<vmem>>, %arg3: memref<288x128xf32, #tpu.memory_space<vmem>>, %arg4: memref<11x128xf32, #tpu.memory_space<vmem>>) attributes {dimension_semantics = [#tpu.dimension_semantics<arbitrary>], iteration_bounds = array<i64: 1>, scalar_prefetch = 0 : i64, scratch_operands = 0 : i64, tpu.core_type = #tpu.core_type<tc>, window_params = [{pipeline_mode = #tpu.pipeline_mode<synchronous>, transform_indices = @transform_0, window_bounds = array<i64: 32, 16>}, {pipeline_mode = #tpu.pipeline_mode<synchronous>, transform_indices = @transform_1, window_bounds = array<i64: 1, 128>}, {pipeline_mode = #tpu.pipeline_mode<synchronous>, transform_indices = @transform_2, window_bounds = array<i64: 288, 128>}, {pipeline_mode = #tpu.pipeline_mode<synchronous>, transform_indices = @transform_3, window_bounds = array<i64: 11, 128>}]} {
    %c0 = arith.constant 0 : index
    %c0_0 = arith.constant 0 : index
    %0 = vector.load %arg2[%c0, %c0_0] : memref<1x128xf32, #tpu.memory_space<vmem>>, vector<1x128xf32>
    %c0_1 = arith.constant 0 : index
    %c0_2 = arith.constant 0 : index
    %1 = vector.load %arg1[%c0_1, %c0_2] : memref<32x16xf32, #tpu.memory_space<vmem>>, vector<32x16xf32>
    %cst = arith.constant dense<0.000000e+00> : vector<16xf32>
    %2 = vector.multi_reduction <add>, %1, %cst [0] : vector<32x16xf32> to vector<16xf32>
    %3 = vector.shape_cast %2 : vector<16xf32> to vector<1x16xf32>
    %cst_3 = arith.constant 3.200000e+01 : f32
    %4 = vector.broadcast %cst_3 : f32 to vector<1x16xf32>
    %5 = arith.divf %3, %4 : vector<1x16xf32>
    %6 = vector.broadcast %5 : vector<1x16xf32> to vector<32x16xf32>
    %7 = arith.subf %1, %6 : vector<32x16xf32>
    %8 = arith.mulf %7, %7 : vector<32x16xf32>
    %cst_4 = arith.constant dense<0.000000e+00> : vector<16xf32>
    %9 = vector.multi_reduction <add>, %8, %cst_4 [0] : vector<32x16xf32> to vector<16xf32>
    %10 = vector.shape_cast %9 : vector<16xf32> to vector<1x16xf32>
    %cst_5 = arith.constant 3.200000e+01 : f32
    %11 = vector.broadcast %cst_5 : f32 to vector<1x16xf32>
    %12 = arith.divf %10, %11 : vector<1x16xf32>
    %c48 = arith.constant 48 : index
    %c0_6 = arith.constant 0 : index
    %13 = vector.load %arg3[%c48, %c0_6] : memref<288x128xf32, #tpu.memory_space<vmem>>, vector<32x16xf32>
    %c80 = arith.constant 80 : index
    %c0_7 = arith.constant 0 : index
    %14 = vector.load %arg3[%c80, %c0_7] : memref<288x128xf32, #tpu.memory_space<vmem>>, vector<32x16xf32>
    %15 = vector.broadcast %5 : vector<1x16xf32> to vector<32x16xf32>
    %16 = arith.subf %1, %15 : vector<32x16xf32>
    %cst_8 = arith.constant 9.99999974E-6 : f32
    %17 = vector.broadcast %cst_8 : f32 to vector<1x16xf32>
    %18 = arith.addf %12, %17 : vector<1x16xf32>
    %19 = math.rsqrt %18 : vector<1x16xf32>
    %20 = vector.broadcast %19 : vector<1x16xf32> to vector<32x16xf32>
    %21 = arith.mulf %16, %20 : vector<32x16xf32>
    %22 = arith.mulf %21, %13 : vector<32x16xf32>
    %23 = arith.addf %22, %14 : vector<32x16xf32>
    %c0_9 = arith.constant 0 : index
    %c0_10 = arith.constant 0 : index
    %24 = vector.load %arg3[%c0_9, %c0_10] : memref<288x128xf32, #tpu.memory_space<vmem>>, vector<16x128xf32>
    %c16 = arith.constant 16 : index
    %c0_11 = arith.constant 0 : index
    %25 = vector.load %arg3[%c16, %c0_11] : memref<288x128xf32, #tpu.memory_space<vmem>>, vector<16x128xf32>
    %cst_12 = arith.constant dense<0.000000e+00> : vector<32x128xf32>
    %26 = tpu.matmul %23, %24, %cst_12 {dimension_numbers = #tpu.dot_dimension_numbers<[1], [0], [0], [1], [0, 0, 1, 1], [], []>} : vector<32x16xf32>, vector<16x128xf32>, vector<32x128xf32> -> vector<32x128xf32>
    %cst_13 = arith.constant dense<0.000000e+00> : vector<32x128xf32>
    %27 = tpu.matmul %23, %25, %cst_13 {dimension_numbers = #tpu.dot_dimension_numbers<[1], [0], [0], [1], [0, 0, 1, 1], [], []>} : vector<32x16xf32>, vector<16x128xf32>, vector<32x128xf32> -> vector<32x128xf32>
    %28 = arith.mulf %26, %27 : vector<32x128xf32>
    %cst_14 = arith.constant dense<0.000000e+00> : vector<128xf32>
    %29 = vector.multi_reduction <add>, %28, %cst_14 [0] : vector<32x128xf32> to vector<128xf32>
    %30 = vector.shape_cast %29 : vector<128xf32> to vector<1x128xf32>
    %31 = arith.mulf %26, %26 : vector<32x128xf32>
    %cst_15 = arith.constant dense<0.000000e+00> : vector<128xf32>
    %32 = vector.multi_reduction <add>, %31, %cst_15 [0] : vector<32x128xf32> to vector<128xf32>
    %33 = vector.shape_cast %32 : vector<128xf32> to vector<1x128xf32>
    %34 = arith.mulf %27, %27 : vector<32x128xf32>
    %cst_16 = arith.constant dense<0.000000e+00> : vector<128xf32>
    %35 = vector.multi_reduction <add>, %34, %cst_16 [0] : vector<32x128xf32> to vector<128xf32>
    %36 = vector.shape_cast %35 : vector<128xf32> to vector<1x128xf32>
    %37 = arith.mulf %33, %36 : vector<1x128xf32>
    %cst_17 = arith.constant 1.000000e-16 : f32
    %38 = vector.broadcast %cst_17 : f32 to vector<1x128xf32>
    %39 = arith.maximumf %37, %38 : vector<1x128xf32>
    %40 = math.rsqrt %39 : vector<1x128xf32>
    %41 = arith.mulf %30, %40 : vector<1x128xf32>
    %42 = arith.mulf %41, %0 : vector<1x128xf32>
    %c32 = arith.constant 32 : index
    %c0_18 = arith.constant 0 : index
    %43 = vector.load %arg3[%c32, %c0_18] : memref<288x128xf32, #tpu.memory_space<vmem>>, vector<8x32xf32>
    %c40 = arith.constant 40 : index
    %c0_19 = arith.constant 0 : index
    %44 = vector.load %arg3[%c40, %c0_19] : memref<288x128xf32, #tpu.memory_space<vmem>>, vector<8x32xf32>
    %c186 = arith.constant 186 : index
    %c0_20 = arith.constant 0 : index
    %45 = vector.load %arg3[%c186, %c0_20] : memref<288x128xf32, #tpu.memory_space<vmem>>, vector<8x128xf32>
    %cst_21 = arith.constant dense<0.000000e+00> : vector<8x128xf32>
    %46 = tpu.matmul %43, %26, %cst_21 {dimension_numbers = #tpu.dot_dimension_numbers<[1], [0], [0], [1], [0, 0, 1, 1], [], []>} : vector<8x32xf32>, vector<32x128xf32>, vector<8x128xf32> -> vector<8x128xf32>
    %cst_22 = arith.constant dense<0.000000e+00> : vector<8x128xf32>
    %47 = tpu.matmul %44, %27, %cst_22 {dimension_numbers = #tpu.dot_dimension_numbers<[1], [0], [0], [1], [0, 0, 1, 1], [], []>} : vector<8x32xf32>, vector<32x128xf32>, vector<8x128xf32> -> vector<8x128xf32>
    %48 = arith.addf %46, %47 : vector<8x128xf32>
    %49 = arith.addf %48, %45 : vector<8x128xf32>
    %cst_23 = arith.constant dense<0.000000e+00> : vector<128xf32>
    %50 = vector.multi_reduction <add>, %49, %cst_23 [0] : vector<8x128xf32> to vector<128xf32>
    %51 = vector.shape_cast %50 : vector<128xf32> to vector<1x128xf32>
    %cst_24 = arith.constant 8.000000e+00 : f32
    %52 = vector.broadcast %cst_24 : f32 to vector<1x128xf32>
    %53 = arith.divf %51, %52 : vector<1x128xf32>
    %54 = vector.broadcast %53 : vector<1x128xf32> to vector<8x128xf32>
    %55 = arith.subf %49, %54 : vector<8x128xf32>
    %56 = arith.mulf %55, %55 : vector<8x128xf32>
    %cst_25 = arith.constant dense<0.000000e+00> : vector<128xf32>
    %57 = vector.multi_reduction <add>, %56, %cst_25 [0] : vector<8x128xf32> to vector<128xf32>
    %58 = vector.shape_cast %57 : vector<128xf32> to vector<1x128xf32>
    %cst_26 = arith.constant 8.000000e+00 : f32
    %59 = vector.broadcast %cst_26 : f32 to vector<1x128xf32>
    %60 = arith.divf %58, %59 : vector<1x128xf32>
    %c194 = arith.constant 194 : index
    %c0_27 = arith.constant 0 : index
    %61 = vector.load %arg3[%c194, %c0_27] : memref<288x128xf32, #tpu.memory_space<vmem>>, vector<8x128xf32>
    %c202 = arith.constant 202 : index
    %c0_28 = arith.constant 0 : index
    %62 = vector.load %arg3[%c202, %c0_28] : memref<288x128xf32, #tpu.memory_space<vmem>>, vector<8x128xf32>
    %63 = vector.broadcast %53 : vector<1x128xf32> to vector<8x128xf32>
    %64 = arith.subf %49, %63 : vector<8x128xf32>
    %cst_29 = arith.constant 9.99999974E-6 : f32
    %65 = vector.broadcast %cst_29 : f32 to vector<1x128xf32>
    %66 = arith.addf %60, %65 : vector<1x128xf32>
    %67 = math.rsqrt %66 : vector<1x128xf32>
    %68 = vector.broadcast %67 : vector<1x128xf32> to vector<8x128xf32>
    %69 = arith.mulf %64, %68 : vector<8x128xf32>
    %70 = arith.mulf %69, %61 : vector<8x128xf32>
    %71 = arith.addf %70, %62 : vector<8x128xf32>
    %cst_30 = arith.constant 5.000000e-01 : f32
    %72 = vector.broadcast %cst_30 : f32 to vector<8x128xf32>
    %73 = arith.mulf %72, %71 : vector<8x128xf32>
    %cst_31 = arith.constant 4.471500e-02 : f32
    %74 = vector.broadcast %cst_31 : f32 to vector<8x128xf32>
    %75 = arith.mulf %74, %71 : vector<8x128xf32>
    %76 = arith.mulf %75, %71 : vector<8x128xf32>
    %77 = arith.mulf %76, %71 : vector<8x128xf32>
    %78 = arith.addf %71, %77 : vector<8x128xf32>
    %cst_32 = arith.constant 0.797884583 : f32
    %79 = vector.broadcast %cst_32 : f32 to vector<8x128xf32>
    %80 = arith.mulf %79, %78 : vector<8x128xf32>
    %81 = math.tanh %80 : vector<8x128xf32>
    %cst_33 = arith.constant 1.000000e+00 : f32
    %82 = vector.broadcast %cst_33 : f32 to vector<8x128xf32>
    %83 = arith.addf %82, %81 : vector<8x128xf32>
    %84 = arith.mulf %73, %83 : vector<8x128xf32>
    %c114 = arith.constant 114 : index
    %c0_34 = arith.constant 0 : index
    %85 = vector.load %arg3[%c114, %c0_34] : memref<288x128xf32, #tpu.memory_space<vmem>>, vector<72x8xf32>
    %c210 = arith.constant 210 : index
    %c0_35 = arith.constant 0 : index
    %86 = vector.load %arg3[%c210, %c0_35] : memref<288x128xf32, #tpu.memory_space<vmem>>, vector<72x128xf32>
    %cst_36 = arith.constant dense<0.000000e+00> : vector<72x128xf32>
    %87 = tpu.matmul %85, %84, %cst_36 {dimension_numbers = #tpu.dot_dimension_numbers<[1], [0], [0], [1], [0, 0, 1, 1], [], []>} : vector<72x8xf32>, vector<8x128xf32>, vector<72x128xf32> -> vector<72x128xf32>
    %88 = arith.addf %87, %86 : vector<72x128xf32>
    %89 = vector.extract_strided_slice %88 {offsets = [0, 0], sizes = [8, 128], strides = [1, 1]} : vector<72x128xf32> to vector<8x128xf32>
    %90 = vector.broadcast %0 : vector<1x128xf32> to vector<8x128xf32>
    %91 = arith.mulf %89, %90 : vector<8x128xf32>
    %92 = vector.extract_strided_slice %88 {offsets = [8, 0], sizes = [64, 128], strides = [1, 1]} : vector<72x128xf32> to vector<64x128xf32>
    %cst_37 = arith.constant 0.000000e+00 : f32
    %93 = vector.broadcast %cst_37 : f32 to vector<64x128xf32>
    %94 = arith.cmpf oge, %92, %93 : vector<64x128xf32>
    %cst_38 = arith.constant 0.00999999977 : f32
    %95 = vector.broadcast %cst_38 : f32 to vector<64x128xf32>
    %96 = arith.mulf %95, %92 : vector<64x128xf32>
    %97 = arith.select %94, %92, %96 : vector<64x128xi1>, vector<64x128xf32>
    %c112 = arith.constant 112 : index
    %c0_39 = arith.constant 0 : index
    %98 = vector.load %arg3[%c112, %c0_39] : memref<288x128xf32, #tpu.memory_space<vmem>>, vector<2x64xf32>
    %c282 = arith.constant 282 : index
    %c0_40 = arith.constant 0 : index
    %99 = vector.load %arg3[%c282, %c0_40] : memref<288x128xf32, #tpu.memory_space<vmem>>, vector<2x128xf32>
    %cst_41 = arith.constant dense<0.000000e+00> : vector<2x128xf32>
    %100 = tpu.matmul %98, %97, %cst_41 {dimension_numbers = #tpu.dot_dimension_numbers<[1], [0], [0], [1], [0, 0, 1, 1], [], []>} : vector<2x64xf32>, vector<64x128xf32>, vector<2x128xf32> -> vector<2x128xf32>
    %101 = arith.addf %100, %99 : vector<2x128xf32>
    %102 = arith.negf %101 : vector<2x128xf32>
    %103 = math.exp %102 : vector<2x128xf32>
    %cst_42 = arith.constant 1.000000e+00 : f32
    %104 = vector.broadcast %cst_42 : f32 to vector<2x128xf32>
    %105 = arith.addf %104, %103 : vector<2x128xf32>
    %106 = arith.divf %104, %105 : vector<2x128xf32>
    %c0_43 = arith.constant 0 : index
    %c0_44 = arith.constant 0 : index
    %107 = vector.load %arg4[%c0_43, %c0_44] : memref<11x128xf32, #tpu.memory_space<vmem>>, vector<8x128xf32>
    tpu.vector_store %arg4[%c0_43, %c0_44], %91 {strides = array<i32>} : memref<11x128xf32, #tpu.memory_space<vmem>>, vector<8x128xf32>,
    %c8 = arith.constant 8 : index
    %c0_45 = arith.constant 0 : index
    %108 = vector.load %arg4[%c8, %c0_45] : memref<11x128xf32, #tpu.memory_space<vmem>>, vector<1x128xf32>
    tpu.vector_store %arg4[%c8, %c0_45], %42 {strides = array<i32>} : memref<11x128xf32, #tpu.memory_space<vmem>>, vector<1x128xf32>,
    %c9 = arith.constant 9 : index
    %c0_46 = arith.constant 0 : index
    %109 = vector.load %arg4[%c9, %c0_46] : memref<11x128xf32, #tpu.memory_space<vmem>>, vector<2x128xf32>
    tpu.vector_store %arg4[%c9, %c0_46], %106 {strides = array<i32>} : memref<11x128xf32, #tpu.memory_space<vmem>>, vector<2x128xf32>,
    return
  }
  func.func @transform_0(%arg0: i32) -> (i32, i32) {
    %c0_i32 = arith.constant 0 : i32
    %c0_i32_0 = arith.constant 0 : i32
    %c0_i32_1 = arith.constant 0 : i32
    return %c0_i32, %c0_i32_0 : i32, i32
  }
  func.func @transform_1(%arg0: i32) -> (i32, i32) {
    %c0_i32 = arith.constant 0 : i32
    %c0_i32_0 = arith.constant 0 : i32
    %c0_i32_1 = arith.constant 0 : i32
    return %c0_i32, %c0_i32_0 : i32, i32
  }
  func.func @transform_2(%arg0: i32) -> (i32, i32) {
    %c0_i32 = arith.constant 0 : i32
    %c0_i32_0 = arith.constant 0 : i32
    %c0_i32_1 = arith.constant 0 : i32
    return %c0_i32, %c0_i32_0 : i32, i32
  }
  func.func @transform_3(%arg0: i32) -> (i32, i32) {
    %c0_i32 = arith.constant 0 : i32
    %c0_i32_0 = arith.constant 0 : i32
    %c0_i32_1 = arith.constant 0 : i32
    return %c0_i32, %c0_i32_0 : i32, i32
  }
}

</mosaic_0001>

<bundles_post_ra>
// kernel: squeeze.1
= control target key start
LH: loop header
LB: loop body
LE: loop exit
PB: predicated region body
PF: predicated region fallthrough
CT: control target
= control target key end

     0   :  { %s207_s0 = inlined_call_operand.vmem [shape: f32[128], index: 0, kind: input, shape index: {}]   ;;  %s208_s1 = inlined_call_operand.hbm [shape: f32[2,8,8], index: 1, kind: output, shape index: {}]  }
   0x1   :  { %v5_v0 = vld [vmem:[%s207_s0] sm:$0x1] }
   0x2   :  { %6 = vst [vmem:[#allocation2] sm:$0x1] %v5_v0 }
   0x3   :  { %2 = vsyncpa [#allocation1], 0  ;;  %s150_s0 = smov 120   ;;  %s151_s8 = smov 104   ;;  %vm8_vm0 = vcmask 64512  }
   0x4   :  { %s152_s9 = smov 112   ;;  %s153_s10 = smov 96  }
   0x5   :  { %s154_s11 = smov 88   ;;  %s155_s12 = smov 80  }
   0x6   :  { %s156_s13 = smov 72   ;;  %s157_s14 = smov 64  }
   0x7   :  { %s158_s15 = smov 56   ;;  %s159_s16 = smov 48  }
   0x8   :  { %s160_s17 = smov 40   ;;  %s161_s18 = smov 32  }
   0x9   :  { %v10_v1 = vld [vmem:[#allocation2] sm:$0x1]   ;;  %s162_s19 = smov 24   ;;  %s163_s20 = smov 16  }
   0xa   :  { %v22_v2 = vld [vmem:[#allocation2] sm:$0x1]   ;;  %11 = vrot.lane.b32.xlu0 %v10_v1, %s150_s0  ;;  %s164_s21 = smov 8   ;;  %s165_s22 = smov [#allocation0]  }
   0xb   :  { %23 = vrot.lane.b32.xlu1 %v22_v2, %s151_s8  ;;  %v16_v3 = vld [vmem:[#allocation2] sm:$0x1]   ;;  %s104_s23 = sshll.u32 %s165_s22, 4  ;;  %s105_s23 = int_to_ptr.vmem [resolvable:$true] %s104_s23 }
   0xc   :  { %v28_v4 = vld [vmem:[#allocation2] sm:$0x1]   ;;  %s126_s24 = scalar_lea.vmem %s105_s23, 256  ;;  %p131_p1 = scmp.lt.s32.totalorder %s105_s23, %s105_s23 }
   0xd   :  { %v34_v5 = vld [vmem:[#allocation2] sm:$0x1]   ;;  %p127_p0 = scmp.ne.s32.totalorder %s105_s23, %s126_s24  ;;  %p132_p2 = scmp.lt.s32.totalorder %s126_s24, %s126_s24 }
   0xe   :  { %17 = vrot.lane.b32.xlu0 %v16_v3, %s152_s9  ;;  %v40_v6 = vld [vmem:[#allocation2] sm:$0x1]  }
   0xf   :  { %29 = vrot.lane.b32.xlu1 %v28_v4, %s153_s10  ;;  %v46_v7 = vld [vmem:[#allocation2] sm:$0x1]   ;;  %p133_p3 = por %p132_p2, %p131_p1 }
  0x10   :  { %v52_v8 = vld [vmem:[#allocation2] sm:$0x1]  }
  0x11   :  { %v58_v9 = vld [vmem:[#allocation2] sm:$0x1]   ;;  %p134_p4 = pnand %p133_p3, %p127_p0 }
  0x12   :  { %35 = vrot.lane.b32.xlu0 %v34_v5, %s154_s11  ;;  %v64_v10 = vld [vmem:[#allocation2] sm:$0x1]  }
  0x13   :  { %41 = vrot.lane.b32.xlu1 %v40_v6, %s155_s12  ;;  %v7_v11 = vld [vmem:[#allocation2] sm:$0x1]  }
  0x14   :  { %9 = vst.msk [vmem:[#allocation0] sm:$0x1] %vm8_vm0, %v7_v11   ;;  %v70_v12 = vld [vmem:[#allocation2] sm:$0x1]  }
  0x15   :  { %v76_v13 = vld [vmem:[#allocation2] sm:$0x1]  }
  0x16   :  { %47 = vrot.lane.b32.xlu0 %v46_v7, %s156_s13  ;;  %v82_v14 = vld [vmem:[#allocation2] sm:$0x1]  }
  0x17   :  { %53 = vrot.lane.b32.xlu1 %v52_v8, %s157_s14  ;;  %v88_v15 = vld [vmem:[#allocation2] sm:$0x1]  }
  0x18   :  { %v94_v16 = vld [vmem:[#allocation2] sm:$0x1]  }
  0x1a   :  { %59 = vrot.lane.b32.xlu0 %v58_v9, %s158_s15 }
  0x1b   :  { %65 = vrot.lane.b32.xlu1 %v64_v10, %s159_s16 }
  0x1e   :  { %71 = vrot.lane.b32.xlu0 %v70_v12, %s160_s17 }
  0x1f   :  { %77 = vrot.lane.b32.xlu1 %v76_v13, %s161_s18 }
  0x22   :  { %83 = vrot.lane.b32.xlu0 %v82_v14, %s162_s19 }
  0x23   :  { %89 = vrot.lane.b32.xlu1 %v88_v15, %s163_s20 }
  0x26   :  { %95 = vrot.lane.b32.xlu0 %v94_v16, %s164_s21 }
  0x7c   :  { %v12_v17 = vpop.permute.xlu0 %11  }
  0x7d   :  { %v24_v18 = vpop.permute.xlu1 %23   ;;  %15 = vst.msk [vmem:[#allocation0 + $0x1] sm:$0x1] %vm8_vm0, %v12_v17  }
  0x7e   :  { %27 = vst.msk [vmem:[#allocation0 + $0x3] sm:$0x1] %vm8_vm0, %v24_v18  }
  0x80   :  { %v18_v19 = vpop.permute.xlu0 %17  }
  0x81   :  { %v30_v20 = vpop.permute.xlu1 %29   ;;  %21 = vst.msk [vmem:[#allocation0 + $0x2] sm:$0x1] %vm8_vm0, %v18_v19  }
  0x82   :  { %33 = vst.msk [vmem:[#allocation0 + $0x4] sm:$0x1] %vm8_vm0, %v30_v20  }
  0x84   :  { %v36_v21 = vpop.permute.xlu0 %35  }
  0x85   :  { %v42_v22 = vpop.permute.xlu1 %41   ;;  %39 = vst.msk [vmem:[#allocation0 + $0x5] sm:$0x1] %vm8_vm0, %v36_v21  }
  0x86   :  { %45 = vst.msk [vmem:[#allocation0 + $0x6] sm:$0x1] %vm8_vm0, %v42_v22  }
  0x88   :  { %v48_v23 = vpop.permute.xlu0 %47  }
  0x89   :  { %v54_v24 = vpop.permute.xlu1 %53   ;;  %51 = vst.msk [vmem:[#allocation0 + $0x7] sm:$0x1] %vm8_vm0, %v48_v23  }
  0x8a   :  { %57 = vst.msk [vmem:[#allocation0 + $0x8] sm:$0x1] %vm8_vm0, %v54_v24  }
  0x8c   :  { %v60_v25 = vpop.permute.xlu0 %59  }
  0x8d   :  { %v66_v26 = vpop.permute.xlu1 %65   ;;  %63 = vst.msk [vmem:[#allocation0 + $0x9] sm:$0x1] %vm8_vm0, %v60_v25  }
  0x8e   :  { %69 = vst.msk [vmem:[#allocation0 + $0xa] sm:$0x1] %vm8_vm0, %v66_v26  }
  0x90   :  { %v72_v27 = vpop.permute.xlu0 %71  }
  0x91   :  { %v78_v28 = vpop.permute.xlu1 %77   ;;  %75 = vst.msk [vmem:[#allocation0 + $0xb] sm:$0x1] %vm8_vm0, %v72_v27  }
  0x92   :  { %81 = vst.msk [vmem:[#allocation0 + $0xc] sm:$0x1] %vm8_vm0, %v78_v28  }
  0x94   :  { %v84_v29 = vpop.permute.xlu0 %83  }
  0x95   :  { %v90_v30 = vpop.permute.xlu1 %89   ;;  %87 = vst.msk [vmem:[#allocation0 + $0xd] sm:$0x1] %vm8_vm0, %v84_v29  }
  0x96   :  { %93 = vst.msk [vmem:[#allocation0 + $0xe] sm:$0x1] %vm8_vm0, %v90_v30  }
  0x98   :  { %v96_v31 = vpop.permute.xlu0 %95  }
  0x99   :  { %99 = vst.msk [vmem:[#allocation0 + $0xf] sm:$0x1] %vm8_vm0, %v96_v31  }
  0x9a   :  { %137 = shalt.err (!%p134_p4)
}
  0x9b   :  { %s138_s27 = scalar_lea.hbm %s208_s1, 256 }
  0x9c   :  { %p139_p5 = scmp.ne.s32.totalorder %s208_s1, %s138_s27  ;;  %p142_p6 = scmp.lt.u32.totalorder %s138_s27, %s208_s1 }
  0x9e   :  { %p144_p7 = pnand %p142_p6, %p139_p5 }
  0xa0   :  { %147 = shalt.err (!%p144_p7)
}
  0xa1   :  { %107 = dma.vmem_to_hbm [thread:$0]  %s105_s23, 256, %s208_s1, [#allocation1]  }
  0xa2   :  { %148 = dma.done.wait [#allocation1], 256  }
  0xa3   :  { %149 = vsyncadd [#allocation1], 4294967040 }
  0xa4   :  { %109 = vsyncpa [#allocation1], 1 }

// kernel: model_head_forward.1
= control target key start
LH: loop header
LB: loop body
LE: loop exit
PB: predicated region body
PF: predicated region fallthrough
CT: control target
= control target key end

     0   :  { %vm19_vm0 = vcmask 130048   ;;  %vm971_vm1 = vmmov 0   ;;  %vm312_vm2 = vcmask 261120   ;;  %vm511_vm3 = vcmask 64512   ;;  %s1193_s2 = inlined_call_operand.vmem [shape: f32[288,128], index: 2, kind: input, shape index: {}]   ;;  %s1194_s0 = inlined_call_operand.vmem [shape: f32[32,16], index: 0, kind: input, shape index: {}]   ;;  %s1195_s1 = inlined_call_operand.vmem [shape: f32[1,128], index: 1, kind: input, shape index: {}]   ;;  %s1196_s3 = inlined_call_operand.vmem [shape: f32[11,128], index: 3, kind: output, shape index: {}]  }
   0x1   :  { %v79_v0 = vld [vmem:[%s1193_s2] sm:$0xff]  ;;  %v80_v1 = vld [vmem:[%s1193_s2 + $0x8] sm:$0xff]  ;;  %v81_v2 = vld [vmem:[%s1193_s2 + $0x10] sm:$0xff]  ;;  %vm682_vm12 = vcmask 523264  }
   0x2   :  { %v921_v3 = vpack.c.bf16 %v80_v1, %v79_v0  ;;  %v82_v4 = vld [vmem:[%s1193_s2 + $0x18] sm:$0xff]  ;;  %v15_v5 = vld [vmem:[%s1194_s0] sm:$0xff]  ;;  %v16_v6 = vld [vmem:[%s1194_s0 + $0x8] sm:$0xff] }
   0x3   :  { %v925_v7 = vpack.c.bf16 %v82_v4, %v81_v2  ;;  %v17_v8 = vld [vmem:[%s1194_s0 + $0x10] sm:$0xff]  ;;  %v18_v9 = vld [vmem:[%s1194_s0 + $0x18] sm:$0xff]  ;;  %v20_v10 = vsel %vm19_vm0, %v15_v5, 0.0  ;;  %v21_v11 = vsel %vm19_vm0, %v16_v6, 0.0  ;;  %v59_v50 = vld [vmem:[%s1193_s2 + $0x40] sm:$0xff]  ;;  %v970_v4 = vmov 0.0|0.0  }
   0x4   :  { %922 = vmatprep.subr.bf16.mxu0 %v921_v3  ;;  %v22_v12 = vadd.f32 %v21_v11, %v20_v10  ;;  %v23_v13 = vsel %vm19_vm0, %v17_v8, 0.0  ;;  %v25_v14 = vsel %vm19_vm0, %v18_v9, 0.0  ;;  %v57_v48 = vld [vmem:[%s1193_s2 + $0x30] sm:$0xff]  ;;  %v58_v49 = vld [vmem:[%s1193_s2 + $0x38] sm:$0xff]  ;;  %v60_v54 = vld [vmem:[%s1193_s2 + $0x48] sm:$0xff] }
   0x5   :  { %926 = vmatprep.subr.bf16.mxu1 %v925_v7  ;;  %924 = vmatpush3.bf16.msra.mxu0 %v921_v3  ;;  %v61_v56 = vld [vmem:[%s1193_s2 + $0x50] sm:$0xff]  ;;  %v62_v57 = vld [vmem:[%s1193_s2 + $0x58] sm:$0xff]  ;;  %v63_v58 = vld [vmem:[%s1193_s2 + $0x60] sm:$0xff] }
   0x6   :  { %928 = vmatpush3.bf16.msra.mxu1 %v925_v7  ;;  %v24_v15 = vadd.f32 %v23_v13, %v22_v12  ;;  %v64_v2 = vld [vmem:[%s1193_s2 + $0x68] sm:$0xff]  ;;  %929 = vmatprep.subr.bf16.mxu0 %v970_v4 }
   0x7   :  { %935 = vmatprep.subr.bf16.mxu1 %v970_v4 }
   0x8   :  { %v26_v16 = vadd.f32 %v25_v14, %v24_v15 }
   0xa   :  { %v27_v17 = vrot.slane %v26_v16, 4 }
   0xc   :  { %v28_v18 = vadd.f32 %v27_v17, %v26_v16 }
   0xe   :  { %v29_v19 = vrot.slane %v28_v18, 2 }
  0x10   :  { %v30_v20 = vadd.f32 %v29_v19, %v28_v18 }
  0x12   :  { %v31_v21 = vrot.slane %v30_v20, 1 }
  0x14   :  { %v32_v22 = vadd.f32 %v31_v21, %v30_v20 }
  0x16   :  { %v34_v23 = vmul.f32 0.03125, %v32_v22 }
  0x18   :  { %v35_v24 = vsub.f32 %v15_v5, %v34_v23  ;;  %v36_v25 = vsub.f32 %v16_v6, %v34_v23  ;;  %v37_v26 = vsub.f32 %v17_v8, %v34_v23  ;;  %v38_v27 = vsub.f32 %v18_v9, %v34_v23 }
  0x19   :  { %v972_v5 = vmov 0.0  }
  0x1a   :  { %v39_v28 = vmul.f32 %v35_v24, %v35_v24  ;;  %v40_v29 = vmul.f32 %v36_v25, %v36_v25  ;;  %v41_v30 = vmul.f32 %v37_v26, %v37_v26  ;;  %v42_v31 = vmul.f32 %v38_v27, %v38_v27 }
  0x1c   :  { %v43_v32 = vsel %vm19_vm0, %v39_v28, 0.0  ;;  %v44_v33 = vsel %vm19_vm0, %v40_v29, 0.0  ;;  %v46_v34 = vsel %vm19_vm0, %v41_v30, 0.0  ;;  %v48_v36 = vsel %vm19_vm0, %v42_v31, 0.0 }
  0x1d   :  { %v45_v35 = vadd.f32 %v44_v33, %v43_v32 }
  0x1f   :  { %v47_v37 = vadd.f32 %v46_v34, %v45_v35 }
  0x21   :  { %v49_v38 = vadd.f32 %v48_v36, %v47_v37  ;;  %v309_v36 = vld [vmem:[%s1193_s2 + $0x20] sm:$0xff]  ;;  %v310_v37 = vld [vmem:[%s1193_s2 + $0x28] sm:$0xff] }
  0x23   :  { %v50_v39 = vrot.slane %v49_v38, 4 }
  0x25   :  { %v51_v40 = vadd.f32 %v50_v39, %v49_v38 }
  0x27   :  { %v52_v41 = vrot.slane %v51_v40, 2 }
  0x29   :  { %v53_v42 = vadd.f32 %v52_v41, %v51_v40 }
  0x2b   :  { %v54_v43 = vrot.slane %v53_v42, 1 }
  0x2d   :  { %v55_v44 = vadd.f32 %v54_v43, %v53_v42 }
  0x2f   :  { %v56_v45 = vmul.f32 0.03125, %v55_v44 }
  0x31   :  { %v65_v46 = vadd.f32 1e-05, %v56_v45 }
  0x33   :  { %958 = vrsqrt.f32 %v65_v46 }
  0x3d   :  { %v959_v47 = vpop.eup %958 }
  0x3e   :  { %v67_v51 = vmul.f32 %v959_v47, %v35_v24  ;;  %v68_v52 = vmul.f32 %v959_v47, %v36_v25  ;;  %v69_v53 = vmul.f32 %v959_v47, %v37_v26  ;;  %v70_v55 = vmul.f32 %v959_v47, %v38_v27 }
  0x40   :  { %v71_v59 = vmul.f32 %v67_v51, %v57_v48  ;;  %v72_v60 = vmul.f32 %v68_v52, %v58_v49  ;;  %v73_v61 = vmul.f32 %v69_v53, %v59_v50  ;;  %v74_v62 = vmul.f32 %v70_v55, %v60_v54 }
  0x42   :  { %v75_v63 = vadd.f32 %v71_v59, %v61_v56  ;;  %v76_v0 = vadd.f32 %v72_v60, %v62_v57  ;;  %v77_v1 = vadd.f32 %v73_v61, %v63_v58  ;;  %v78_v3 = vadd.f32 %v74_v62, %v64_v2  ;;  %v1082_v62 = vld [vmem:[%s1195_s1] sm:$0x1] }
  0x44   :  { %835 = vmatprep.mubr.msk.f32.mxu0 %vm19_vm0, %v75_v63  ;;  %845 = vmatprep.mubr.msk.f32.mxu1 %vm19_vm0, %v75_v63 }
  0x45   :  { %836 = vmatmul.mubr.msk.f32.vlgmr.msra.gmra.mrb[0].mxu0 %vm19_vm0, %v76_v0  ;;  %846 = vmatmul.mubr.msk.f32.vlgmr.msra.gmra.mrb[0].mxu1 %vm19_vm0, %v76_v0 }
  0x46   :  { %838 = vmatprep.mubr.msk.f32.mxu0 %vm19_vm0, %v77_v1  ;;  %848 = vmatprep.mubr.msk.f32.mxu1 %vm19_vm0, %v77_v1 }
  0x49   :  { %839 = vmatmul.mubr.msk.f32.gmra.mrb[2].mxu0 %vm19_vm0, %v78_v3  ;;  %849 = vmatmul.mubr.msk.f32.gmra.mrb[2].mxu1 %vm19_vm0, %v78_v3  ;;  %v311_v3 = vld [vmem:[%s1193_s2 + $0xba] sm:$0xff] }
  0x4a   :  { %859 = vmatprep.mubr.msk.f32.mxu0 %vm971_vm1, %v972_v5  ;;  %870 = vmatprep.mubr.msk.f32.mxu1 %vm971_vm1, %v972_v5 }
 0x118   :  { %v837_v6 = vpop.f32.mrb[0].mxu0  ;;  %v847_v7 = vpop.f32.mrb[0].mxu1 }
 0x119   :  { %v279_v8 = vmul.f32 %v837_v6, %v837_v6  ;;  %v266_v9 = vmul.f32 %v847_v7, %v837_v6  ;;  %v292_v10 = vmul.f32 %v847_v7, %v847_v7  ;;  %v161_v11 = vpop.f32.mrb[1].mxu0  ;;  %v246_v12 = vpop.f32.mrb[1].mxu1 }
 0x11a   :  { %v278_v13 = vmul.f32 %v161_v11, %v161_v11  ;;  %v936_v14 = vpack.c.bf16 %v837_v6, %v161_v11  ;;  %v265_v15 = vmul.f32 %v246_v12, %v161_v11  ;;  %v291_v16 = vmul.f32 %v246_v12, %v246_v12 }
 0x11b   :  { %v930_v17 = vpack.c.bf16 %v847_v7, %v246_v12 }
 0x11c   :  { %v282_v18 = vadd.f32 %v279_v8, %v278_v13  ;;  %v269_v19 = vadd.f32 %v266_v9, %v265_v15  ;;  %v295_v20 = vadd.f32 %v292_v10, %v291_v16  ;;  %v840_v21 = vpop.f32.mrb[2].mxu0  ;;  %v850_v22 = vpop.f32.mrb[2].mxu1  ;;  %937 = vmatpush3.bf16.msra.mxu1 %v936_v14 }
 0x11d   :  { %v268_v23 = vmul.f32 %v850_v22, %v840_v21  ;;  %931 = vmatpush3.bf16.msra.mxu0 %v930_v17  ;;  %v171_v24 = vpop.f32.mrb[3].mxu0  ;;  %v256_v25 = vpop.f32.mrb[3].mxu1  ;;  %938 = vmatprep.subr.bf16.mxu1 %v970_v4  ;;  %v281_v30 = vmul.f32 %v840_v21, %v840_v21  ;;  %v294_v32 = vmul.f32 %v850_v22, %v850_v22 }
 0x11e   :  { %v280_v26 = vmul.f32 %v171_v24, %v171_v24  ;;  %v939_v27 = vpack.c.bf16 %v840_v21, %v171_v24  ;;  %v267_v28 = vmul.f32 %v256_v25, %v171_v24  ;;  %v293_v29 = vmul.f32 %v256_v25, %v256_v25  ;;  %932 = vmatprep.subr.bf16.mxu0 %v970_v4 }
 0x11f   :  { %v933_v31 = vpack.c.bf16 %v850_v22, %v256_v25 }
 0x120   :  { %v283_v33 = vadd.f32 %v282_v18, %v280_v26  ;;  %v270_v34 = vadd.f32 %v269_v19, %v267_v28  ;;  %v296_v35 = vadd.f32 %v295_v20, %v293_v29  ;;  %940 = vmatpush3.bf16.msra.mxu1 %v939_v27  ;;  %v477_v28 = vld [vmem:[%s1193_s2 + $0xc2] sm:$0xff] }
 0x121   :  { %934 = vmatpush3.bf16.msra.mxu0 %v933_v31  ;;  %953 = vmatprep.subr.mxu1 %v972_v5 }
 0x122   :  { %v284_v38 = vadd.f32 %v283_v33, %v281_v30  ;;  %v271_v39 = vadd.f32 %v270_v34, %v268_v23  ;;  %v297_v40 = vadd.f32 %v296_v35, %v294_v32  ;;  %873 = vmatprep.subr.mxu0 %v972_v5  ;;  %v478_v30 = vld [vmem:[%s1193_s2 + $0xca] sm:$0xff] }
 0x123   :  { %871 = vmatmul.mubr.msk.f32.vlgmr.msra.gmra.mrb[4].mxu1 %vm312_vm2, %v309_v36 }
 0x124   :  { %v285_v41 = vrot.slane %v284_v38, 4  ;;  %v298_v42 = vrot.slane %v297_v40, 4  ;;  %860 = vmatmul.mubr.msk.f32.vlgmr.msra.gmra.mrb[4].mxu0 %vm312_vm2, %v310_v37  ;;  %890 = vmatprep.mubr.msk.f32.mxu1 %vm971_vm1, %v972_v5  ;;  %v272_v47 = vrot.slane %v271_v39, 4 }
 0x125   :  { %875 = vmatprep.mubr.msk.f32.mxu0 %vm971_vm1, %v972_v5 }
 0x126   :  { %v286_v43 = vadd.f32 %v285_v41, %v284_v38  ;;  %v299_v44 = vadd.f32 %v298_v42, %v297_v40  ;;  %v273_v52 = vadd.f32 %v272_v47, %v271_v39  ;;  %v493_v42 = vld [vmem:[%s1193_s2 + $0x72] sm:$0xff]  ;;  %v500_v47 = vld [vmem:[%s1193_s2 + $0xaa] sm:$0xff] }
 0x128   :  { %v287_v45 = vrot.slane %v286_v43, 2  ;;  %v300_v46 = vrot.slane %v299_v44, 2  ;;  %v274_v56 = vrot.slane %v273_v52, 2 }
 0x12a   :  { %v288_v48 = vadd.f32 %v287_v45, %v286_v43  ;;  %v301_v49 = vadd.f32 %v300_v46, %v299_v44  ;;  %v275_v58 = vadd.f32 %v274_v56, %v273_v52  ;;  %v498_v43 = vld [vmem:[%s1193_s2 + $0x9a] sm:$0xff]  ;;  %v499_v45 = vld [vmem:[%s1193_s2 + $0xa2] sm:$0xff] }
 0x12b   :  { %v494_v44 = vld [vmem:[%s1193_s2 + $0x7a] sm:$0xff]  ;;  %v495_v46 = vld [vmem:[%s1193_s2 + $0x82] sm:$0xff] }
 0x12c   :  { %v289_v50 = vrot.slane %v288_v48, 1  ;;  %v302_v51 = vrot.slane %v301_v49, 1  ;;  %v276_v59 = vrot.slane %v275_v58, 1 }
 0x12e   :  { %v290_v53 = vadd.f32 %v289_v50, %v288_v48  ;;  %v303_v54 = vadd.f32 %v302_v51, %v301_v49  ;;  %v277_v60 = vadd.f32 %v276_v59, %v275_v58  ;;  %v496_v48 = vld [vmem:[%s1193_s2 + $0x8a] sm:$0xff]  ;;  %v501_v49 = vld [vmem:[%s1193_s2 + $0xb2] sm:$0xff]  ;;  %v650_v51 = vlaneseq }
 0x12f   :  { %v497_v50 = vld [vmem:[%s1193_s2 + $0x92] sm:$0xff] }
 0x130   :  { %v304_v55 = vmul.f32 %v303_v54, %v290_v53  ;;  %v651_v52 = vshrl.u32 %v650_v51, 7  ;;  %v502_v54 = vld [vmem:[%s1193_s2 + $0xd2] sm:$0xff] }
 0x132   :  { %v305_v57 = vmax.f32 %v304_v55, 1e-16  ;;  %v652_v53 = vsub.s32 0, %v651_v52  ;;  %v507_v55 = vld [vmem:[%s1193_s2 + $0xfa] sm:$0xff] }
 0x134   :  { %960 = vrsqrt.f32 %v305_v57  ;;  %v653_v56 = vrot.slane %v1082_v62, %v652_v53 }
 0x13e   :  { %v961_v61 = vpop.eup %960 }
 0x13f   :  { %v307_v63 = vmul.f32 %v961_v61, %v277_v60 }
 0x141   :  { %v308_v0 = vmul.f32 %v307_v63, %v1082_v62  ;;  %v503_v63 = vld [vmem:[%s1193_s2 + $0xda] sm:$0xff] }
 0x143   :  { %763 = vst [vmem:[%s1196_s3 + $0x8] sm:$0x1] %v308_v0  ;;  %v508_v0 = vld [vmem:[%s1193_s2 + $0x102] sm:$0xff] }
 0x1f6   :  { %v455_v1 = vpop.f32.mrb[4].mxu1 }
 0x1f7   :  { %v382_v2 = vpop.f32.mrb[4].mxu0  ;;  %v872_v6 = vpop.f32.mrb[5].mxu1 }
 0x1f8   :  { %v456_v7 = vadd.f32 %v455_v1, %v382_v2  ;;  %v861_v8 = vpop.f32.mrb[5].mxu0 }
 0x1fa   :  { %v459_v9 = vadd.f32 %v456_v7, %v311_v3 }
 0x1fc   :  { %v460_v10 = vrot.slane %v459_v9, 4 }
 0x1fe   :  { %v461_v11 = vadd.f32 %v460_v10, %v459_v9  ;;  %v504_v10 = vld [vmem:[%s1193_s2 + $0xe2] sm:$0xff] }
 0x200   :  { %v462_v12 = vrot.slane %v461_v11, 2 }
 0x202   :  { %v463_v13 = vadd.f32 %v462_v12, %v461_v11  ;;  %v509_v11 = vld [vmem:[%s1193_s2 + $0x10a] sm:$0xff] }
 0x204   :  { %v464_v14 = vrot.slane %v463_v13, 1 }
 0x206   :  { %v465_v15 = vadd.f32 %v464_v14, %v463_v13 }
 0x208   :  { %v467_v16 = vmul.f32 0.125, %v465_v15 }
 0x20a   :  { %v468_v17 = vsub.f32 %v459_v9, %v467_v16 }
 0x20c   :  { %v469_v18 = vmul.f32 %v468_v17, %v468_v17 }
 0x20e   :  { %v470_v19 = vrot.slane %v469_v18, 4 }
 0x210   :  { %v471_v20 = vadd.f32 %v470_v19, %v469_v18 }
 0x212   :  { %v472_v21 = vrot.slane %v471_v20, 2 }
 0x214   :  { %v473_v22 = vadd.f32 %v472_v21, %v471_v20 }
 0x216   :  { %v474_v23 = vrot.slane %v473_v22, 1 }
 0x218   :  { %v475_v24 = vadd.f32 %v474_v23, %v473_v22  ;;  %v505_v22 = vld [vmem:[%s1193_s2 + $0xea] sm:$0xff] }
 0x21a   :  { %v476_v25 = vmul.f32 0.125, %v475_v24  ;;  %v510_v24 = vld [vmem:[%s1193_s2 + $0x112] sm:$0xff] }
 0x21c   :  { %v479_v26 = vadd.f32 1e-05, %v476_v25 }
 0x21e   :  { %962 = vrsqrt.f32 %v479_v26 }
 0x228   :  { %v963_v27 = vpop.eup %962 }
 0x229   :  { %v481_v29 = vmul.f32 %v963_v27, %v468_v17 }
 0x22b   :  { %v482_v31 = vmul.f32 %v481_v29, %v477_v28 }
 0x22d   :  { %v483_v32 = vadd.f32 %v482_v31, %v478_v30 }
 0x22f   :  { %v485_v33 = vmul.f32 0.044715, %v483_v32  ;;  %v484_v39 = vmul.f32 0.5, %v483_v32 }
 0x231   :  { %v486_v34 = vmul.f32 %v485_v33, %v483_v32 }
 0x233   :  { %v487_v35 = vmul.f32 %v486_v34, %v483_v32 }
 0x235   :  { %v488_v36 = vadd.f32 %v487_v35, %v483_v32 }
 0x237   :  { %v489_v37 = vmul.f32 0.7978846, %v488_v36  ;;  %v506_v36 = vld [vmem:[%s1193_s2 + $0xf2] sm:$0xff] }
 0x239   :  { %964 = vtanh.f32 %v489_v37 }
 0x243   :  { %v965_v38 = vpop.eup %964 }
 0x244   :  { %v491_v40 = vadd.f32 1.0, %v965_v38 }
 0x246   :  { %v492_v41 = vmul.f32 %v491_v40, %v484_v39 }
 0x248   :  { %874 = vmatpush3.msra.mxu0 %v492_v41  ;;  %954 = vmatpush3.msra.mxu1 %v492_v41 }
 0x249   :  { %876 = vmatmul.mubr.msk.f32.vlgmr.msra.gmra.mrb[6].mxu0 %vm511_vm3, %v493_v42  ;;  %891 = vmatmul.mubr.msk.f32.vlgmr.msra.gmra.mrb[6].mxu1 %vm511_vm3, %v498_v43 }
 0x24a   :  { %878 = vmatprep.mubr.msk.f32.mxu0 %vm971_vm1, %v972_v5  ;;  %893 = vmatprep.mubr.msk.f32.mxu1 %vm971_vm1, %v972_v5 }
 0x24b   :  { %941 = vmatprep.subr.bf16.mxu1 %v970_v4 }
 0x24d   :  { %879 = vmatmul.mubr.msk.f32.gmra.mrb[8].mxu0 %vm511_vm3, %v494_v44  ;;  %894 = vmatmul.mubr.msk.f32.gmra.mrb[8].mxu1 %vm511_vm3, %v499_v45 }
 0x24e   :  { %881 = vmatprep.mubr.msk.f32.mxu0 %vm971_vm1, %v972_v5  ;;  %896 = vmatprep.mubr.msk.f32.mxu1 %vm971_vm1, %v972_v5 }
 0x251   :  { %882 = vmatmul.mubr.msk.f32.gmra.mrb[10].mxu0 %vm511_vm3, %v495_v46  ;;  %897 = vmatmul.mubr.msk.f32.gmra.mrb[10].mxu1 %vm511_vm3, %v500_v47 }
 0x252   :  { %884 = vmatprep.mubr.msk.f32.mxu0 %vm971_vm1, %v972_v5  ;;  %899 = vmatprep.mubr.msk.f32.mxu1 %vm971_vm1, %v972_v5 }
 0x255   :  { %885 = vmatmul.mubr.msk.f32.gmra.mrb[12].mxu0 %vm511_vm3, %v496_v48  ;;  %900 = vmatmul.mubr.msk.f32.gmra.mrb[12].mxu1 %vm511_vm3, %v501_v49  ;;  %v680_v49 = vld [vmem:[%s1193_s2 + $0x70] sm:$0x3] }
 0x256   :  { %887 = vmatprep.mubr.msk.f32.mxu0 %vm971_vm1, %v972_v5  ;;  %918 = vmatprep.mubr.msk.f32.mxu1 %vm971_vm1, %v972_v5 }
 0x259   :  { %888 = vmatmul.mubr.msk.f32.gmra.mrb[14].mxu0 %vm511_vm3, %v497_v50  ;;  %v681_v50 = vld [vmem:[%s1193_s2 + $0x11a] sm:$0x3] }
 0x31c   :  { %v605_v57 = vpop.f32.mrb[6].mxu0  ;;  %v630_v58 = vpop.f32.mrb[6].mxu1 }
 0x31d   :  { %v606_v59 = vadd.f32 %v605_v57, %v502_v54  ;;  %v877_v60 = vpop.f32.mrb[7].mxu0  ;;  %v631_v5 = vadd.f32 %v630_v58, %v507_v55  ;;  %v892_v61 = vpop.f32.mrb[7].mxu1 }
 0x31f   :  { %v655_v1 = vmul.f32 %v653_v56, %v606_v59  ;;  %v668_v2 = vmul.f32 0.01, %v631_v5  ;;  %vm660_vm4 = vcmp.ge.f32.partialorder %v631_v5, 0.0 }
 0x320   :  { %v610_v3 = vpop.f32.mrb[8].mxu0  ;;  %v635_v6 = vpop.f32.mrb[8].mxu1 }
 0x321   :  { %762 = vst [vmem:[%s1196_s3] sm:$0xff] %v655_v1  ;;  %v611_v62 = vadd.f32 %v610_v3, %v503_v63  ;;  %v880_v7 = vpop.f32.mrb[9].mxu0  ;;  %v636_v8 = vadd.f32 %v635_v6, %v508_v0  ;;  %v895_v9 = vpop.f32.mrb[9].mxu1  ;;  %v676_v12 = vsel %vm660_vm4, %v631_v5, %v668_v2 }
 0x323   :  { %vm661_vm5 = vcmp.ge.f32.partialorder %v636_v8, 0.0  ;;  %v669_v13 = vmul.f32 0.01, %v636_v8  ;;  %v664_v16 = vmul.f32 0.01, %v611_v62  ;;  %vm656_vm6 = vcmp.ge.f32.partialorder %v611_v62, 0.0 }
 0x324   :  { %v615_v14 = vpop.f32.mrb[10].mxu0  ;;  %v640_v15 = vpop.f32.mrb[10].mxu1 }
 0x325   :  { %v616_v17 = vadd.f32 %v615_v14, %v504_v10  ;;  %v883_v18 = vpop.f32.mrb[11].mxu0  ;;  %v677_v19 = vsel %vm661_vm5, %v636_v8, %v669_v13  ;;  %v641_v20 = vadd.f32 %v640_v15, %v509_v11  ;;  %v898_v21 = vpop.f32.mrb[11].mxu1  ;;  %v672_v29 = vsel %vm656_vm6, %v611_v62, %v664_v16 }
 0x326   :  { %v948_v23 = vpack.c.bf16 %v677_v19, %v676_v12 }
 0x327   :  { %vm657_vm7 = vcmp.ge.f32.partialorder %v616_v17, 0.0  ;;  %v665_v25 = vmul.f32 0.01, %v616_v17  ;;  %v670_v26 = vmul.f32 0.01, %v641_v20  ;;  %vm662_vm8 = vcmp.ge.f32.partialorder %v641_v20, 0.0 }
 0x328   :  { %v620_v27 = vpop.f32.mrb[12].mxu0  ;;  %v645_v28 = vpop.f32.mrb[12].mxu1 }
 0x329   :  { %v673_v30 = vsel %vm657_vm7, %v616_v17, %v665_v25  ;;  %v621_v31 = vadd.f32 %v620_v27, %v505_v22  ;;  %v886_v32 = vpop.f32.mrb[13].mxu0  ;;  %v646_v33 = vadd.f32 %v645_v28, %v510_v24  ;;  %v901_v34 = vpop.f32.mrb[13].mxu1  ;;  %v678_v37 = vsel %vm662_vm8, %v641_v20, %v670_v26 }
 0x32a   :  { %v942_v35 = vpack.c.bf16 %v673_v30, %v672_v29 }
 0x32b   :  { %vm663_vm9 = vcmp.ge.f32.partialorder %v646_v33, 0.0  ;;  %v671_v38 = vmul.f32 0.01, %v646_v33  ;;  %v666_v40 = vmul.f32 0.01, %v621_v31  ;;  %vm658_vm10 = vcmp.ge.f32.partialorder %v621_v31, 0.0 }
 0x32c   :  { %v625_v39 = vpop.f32.mrb[14].mxu0  ;;  %943 = vmatpush3.bf16.msra.mxu1 %v942_v35 }
 0x32d   :  { %v626_v41 = vadd.f32 %v625_v39, %v506_v36  ;;  %v889_v42 = vpop.f32.mrb[15].mxu0  ;;  %v679_v43 = vsel %vm663_vm9, %v646_v33, %v671_v38  ;;  %944 = vmatprep.subr.bf16.mxu1 %v970_v4  ;;  %v674_v46 = vsel %vm658_vm10, %v621_v31, %v666_v40 }
 0x32e   :  { %v951_v44 = vpack.c.bf16 %v679_v43, %v678_v37 }
 0x32f   :  { %vm659_vm11 = vcmp.ge.f32.partialorder %v626_v41, 0.0  ;;  %v667_v45 = vmul.f32 0.01, %v626_v41 }
 0x331   :  { %v675_v47 = vsel %vm659_vm11, %v626_v41, %v667_v45 }
 0x332   :  { %v945_v48 = vpack.c.bf16 %v675_v47, %v674_v46 }
 0x334   :  { %946 = vmatpush3.bf16.msra.mxu1 %v945_v48 }
 0x335   :  { %947 = vmatprep.subr.bf16.mxu1 %v970_v4 }
 0x338   :  { %949 = vmatpush3.bf16.msra.mxu1 %v948_v23 }
 0x339   :  { %950 = vmatprep.subr.bf16.mxu1 %v970_v4 }
 0x33c   :  { %952 = vmatpush3.bf16.msra.mxu1 %v951_v44 }
 0x33f   :  { %919 = vmatmul.mubr.msk.f32.vlgmr.msra.gmra.mrb[14].mxu1 %vm682_vm12, %v680_v49 }
 0x412   :  { %v752_v51 = vpop.f32.mrb[14].mxu1 }
 0x413   :  { %v753_v52 = vadd.f32 %v752_v51, %v681_v50  ;;  %v920_v53 = vpop.f32.mrb[15].mxu1 }
 0x415   :  { %v789_v54 = vmul.f32 -1.442695, %v753_v52 }
 0x417   :  { %966 = vpow2.f32 %v789_v54 }
 0x421   :  { %v967_v55 = vpop.eup %966 }
 0x422   :  { %v759_v56 = vadd.f32 1.0, %v967_v55 }
 0x424   :  { %968 = vrcp.f32 %v759_v56 }
 0x42e   :  { %v969_v4 = vpop.eup %968 }
 0x42f   :  { %764 = vst [vmem:[%s1196_s3 + $0x9] sm:$0x3] %v969_v4 }

</bundles_post_ra>
